<compile_context>
chip_gen: v7x
topology: tpu7x:2x2x1
jax: 0.10.0
libtpu: 0.0.40
codegen_flags: <defaults>
</compile_context>

<pallas_src>
import functools

import jax
import jax.numpy as jnp
from jax import lax
from jax.experimental import pallas as pl
from jax.experimental.pallas import tpu as pltpu

_POINTWISE_BLOCK_BYTES = 4 << 20      # elementwise path: few temps, go bigger
_WINDOW_BLOCK_BYTES = 2 << 20         # windowed paths: ~5-8 live f32 temps per block
_FLAT_SPATIAL_MAX_PLANE = 256 * 256   # flattened-plane path only for planes <= this
_VMEM_LIMIT_BYTES = 48 * 1024 * 1024  # fits v5e/v6e (128 MiB) and v7x (64 MiB)


def _round_down(n, m):
    return max(m, (n // m) * m)


def _row_block(rows, row_bytes, target_bytes, sub_mult):
    """Pick a sublane-dim block: full extent if it fits, else a sub_mult multiple."""
    cap = max(1, target_bytes // max(1, row_bytes))
    if rows <= cap:
        return rows                      # full extent is always a legal block dim
    return _round_down(cap, sub_mult)    # multiple of the native sublane tiling


# ------------------------------------------------------------------ kernels ----

def _lrn_pointwise_kernel(x_ref, o_ref, *, alpha, beta):
    # local_size == 1: the window average is just x^2.  x_ref/o_ref: (B, L).
    x = x_ref[...].astype(jnp.float32)
    # base >= 1 for alpha >= 0, so exp/log is safe (EUP work, no vector divide).
    inv_div = jnp.exp(-beta * jnp.log(x * x * alpha + 1.0))
    o_ref[...] = (x * inv_div).astype(o_ref.dtype)


def _lrn_spatial_flat_kernel(x_ref, o_ref, *, H, W, local_size, alpha_s, beta):
    """Within-channel LRN on flattened planes.

    x_ref/o_ref: (Bp, H*W) -- each row is one (H, W) plane flattened, so the lane
    axis is H*W (lane-dense even when W < 128).  The separable k x k window sum
    becomes lane rotations (pltpu.roll, XLU slot) plus border masks (VPU); there is
    no VMEM scratch pad and no full-scratch memset.
    """
    k = local_size
    p = (k - 1) // 2
    Bp, L = x_ref.shape

    x = x_ref[...].astype(jnp.float32)
    xsq = x * x

    # Flat lane index; column coordinate without integer div/mod (exact: L < 2^24).
    idx = lax.broadcasted_iota(jnp.int32, (Bp, L), 1)
    idx_f = idx.astype(jnp.float32)
    col = idx_f - jnp.floor(idx_f / float(W)) * float(W)

    # Pass 1: window sum over row offsets dy (lane rotation by dy*W).
    rowsum = jnp.zeros((Bp, L), jnp.float32)
    for dy in range(-p, p + 1):
        if abs(dy) >= H:
            continue
        if dy == 0:
            rowsum = rowsum + xsq
            continue
        shifted = pltpu.roll(xsq, (-dy * W) % L, axis=1)
        if dy > 0:
            mask = idx < (H - dy) * W
        else:
            mask = idx >= (-dy) * W
        rowsum = rowsum + jnp.where(mask, shifted, 0.0)

    # Pass 2: window sum over column offsets dx (lane rotation by dx).
    acc = jnp.zeros((Bp, L), jnp.float32)
    for dx in range(-p, p + 1):
        if abs(dx) >= W:
            continue
        if dx == 0:
            acc = acc + rowsum
            continue
        shifted = pltpu.roll(rowsum, (-dx) % L, axis=1)
        if dx > 0:
            mask = col < float(W - dx)
        else:
            mask = col >= float(-dx)
        acc = acc + jnp.where(mask, shifted, 0.0)

    # alpha_s = alpha / k^2 folds the average; 1/div via exp(-beta*log(base)),
    # base >= 1 for alpha >= 0.
    inv_div = jnp.exp(-beta * jnp.log(acc * alpha_s + 1.0))
    o_ref[...] = (x * inv_div).astype(o_ref.dtype)


def _lrn_spatial_pad_kernel(x_ref, o_ref, pad_ref, *, local_size, alpha_s, beta):
    """Fallback within-channel LRN (H*W not a multiple of 128 or plane too large).

    x_ref/o_ref: (B, H, W); pad_ref: (B, H+2p, W+2p) f32 scratch.  Only the 2p-wide
    halo is zeroed each step; the interior is fully overwritten.
    """
    k = local_size
    p = (k - 1) // 2
    B, H, W = x_ref.shape
    x = x_ref[...].astype(jnp.float32)

    pad_ref[:, :p, :] = jnp.zeros((B, p, W + 2 * p), jnp.float32)
    pad_ref[:, p + H:, :] = jnp.zeros((B, p, W + 2 * p), jnp.float32)
    pad_ref[:, p:p + H, :p] = jnp.zeros((B, H, p), jnp.float32)
    pad_ref[:, p:p + H, p + W:] = jnp.zeros((B, H, p), jnp.float32)
    pad_ref[:, p:p + H, p:p + W] = x * x

    # Separable window sum: k adds over rows (dy), then k adds over columns (dx).
    rowsum = jnp.zeros((B, H, W + 2 * p), jnp.float32)
    for dy in range(k):
        rowsum = rowsum + pad_ref[:, dy:dy + H, :]
    acc = jnp.zeros((B, H, W), jnp.float32)
    for dx in range(k):
        acc = acc + rowsum[:, :, dx:dx + W]

    inv_div = jnp.exp(-beta * jnp.log(acc * alpha_s + 1.0))
    o_ref[...] = (x * inv_div).astype(o_ref.dtype)


def _lrn_across_kernel(x_ref, o_ref, pad_ref, *, local_size, alpha_s, beta):
    # Across-channel LRN.  x_ref/o_ref: (1, C, T); pad_ref: (1, C+2p, T) f32 scratch.
    k = local_size
    p = (k - 1) // 2
    _, C, T = x_ref.shape
    x = x_ref[...].astype(jnp.float32)

    # Zero only the 2p halo rows; the interior is fully overwritten every step.
    pad_ref[:, :p, :] = jnp.zeros((1, p, T), jnp.float32)
    pad_ref[:, p + C:, :] = jnp.zeros((1, p, T), jnp.float32)
    pad_ref[:, p:p + C, :] = x * x

    acc = jnp.zeros((1, C, T), jnp.float32)
    for dc in range(k):
        acc = acc + pad_ref[:, dc:dc + C, :]

    inv_div = jnp.exp(-beta * jnp.log(acc * alpha_s + 1.0))
    o_ref[...] = (x * inv_div).astype(o_ref.dtype)


# ------------------------------------------------------------------ wrapper ----

def lrn_pallas(x, local_size=1, alpha=1.0, beta=0.75, across_channels=False):
    """Pallas TPU implementation of LRN.forward for NCHW input x."""
    if local_size != 1 and local_size % 2 == 0:
        raise ValueError("local_size must be odd (even sizes are shape-inconsistent "
                         "in the reference PyTorch module).")
    N, C, H, W = x.shape
    p = (local_size - 1) // 2
    itemsize = jnp.dtype(x.dtype).itemsize
    sub = max(8, 32 // itemsize)            # sublane multiple: f32 8, bf16 16, int8 32
    total = N * C * H * W
    bytes_accessed = 2 * total * itemsize   # read x + write out (minimal HBM traffic)
    alpha = float(alpha)
    beta = float(beta)

    if p == 0:
        # local_size == 1: element-wise; flatten planes into lane-dense rows.
        R, L = N * C, H * W
        xr = x.reshape(R, L)
        B = _row_block(R, L * 4, _POINTWISE_BLOCK_BYTES, sub)
        kernel = functools.partial(_lrn_pointwise_kernel, alpha=alpha, beta=beta)
        out = pl.pallas_call(
            kernel,
            out_shape=jax.ShapeDtypeStruct((R, L), x.dtype),
            grid=(pl.cdiv(R, B),),
            in_specs=[pl.BlockSpec((B, L), lambda i: (i, 0))],
            out_specs=pl.BlockSpec((B, L), lambda i: (i, 0)),
            compiler_params=pltpu.CompilerParams(
                dimension_semantics=("parallel",),
                vmem_limit_bytes=_VMEM_LIMIT_BYTES),
            cost_estimate=pl.CostEstimate(
                flops=5 * total, transcendentals=2 * total,
                bytes_accessed=bytes_accessed),
        )(xr)
        return out.reshape(N, C, H, W)

    if across_channels:
        HW = H * W
        xr = x.reshape(N, C, HW)
        if HW >= 128:
            # Size by total block bytes (C*T*4 ~ 2 MiB) so large C still gets long DMAs.
            t_cap = _round_down(max(1, _WINDOW_BLOCK_BYTES // (C * 4)), 128)
            T = min(t_cap, (HW // 128) * 128)
        else:
            T = HW  # full extent on the last axis is always a legal block
        kernel = functools.partial(
            _lrn_across_kernel, local_size=local_size,
            alpha_s=alpha / float(local_size), beta=beta)
        out = pl.pallas_call(
            kernel,
            out_shape=jax.ShapeDtypeStruct((N, C, HW), x.dtype),
            grid=(N, pl.cdiv(HW, T)),
            in_specs=[pl.BlockSpec((1, C, T), lambda n, t: (n, 0, t))],
            out_specs=pl.BlockSpec((1, C, T), lambda n, t: (n, 0, t)),
            scratch_shapes=[pltpu.VMEM((1, C + 2 * p, T), jnp.float32)],
            compiler_params=pltpu.CompilerParams(
                dimension_semantics=("parallel", "parallel"),
                vmem_limit_bytes=_VMEM_LIMIT_BYTES),
            cost_estimate=pl.CostEstimate(
                flops=(local_size + 6) * total, transcendentals=2 * total,
                bytes_accessed=bytes_accessed),
        )(xr)
        return out.reshape(N, C, H, W)

    # Within-channel (spatial) path.
    L = H * W
    R = N * C
    if L % 128 == 0 and L <= _FLAT_SPATIAL_MAX_PLANE:
        # Lane-dense flattened-plane kernel (no scratch, roll-based window sum).
        xr = x.reshape(R, L)
        Bp = _row_block(R, L * 4, _WINDOW_BLOCK_BYTES, sub)
        kernel = functools.partial(
            _lrn_spatial_flat_kernel, H=H, W=W, local_size=local_size,
            alpha_s=alpha / float(local_size * local_size), beta=beta)
        out = pl.pallas_call(
            kernel,
            out_shape=jax.ShapeDtypeStruct((R, L), x.dtype),
            grid=(pl.cdiv(R, Bp),),
            in_specs=[pl.BlockSpec((Bp, L), lambda i: (i, 0))],
            out_specs=pl.BlockSpec((Bp, L), lambda i: (i, 0)),
            compiler_params=pltpu.CompilerParams(
                dimension_semantics=("parallel",),
                vmem_limit_bytes=_VMEM_LIMIT_BYTES),
            cost_estimate=pl.CostEstimate(
                flops=(2 * local_size + 8) * total, transcendentals=2 * total,
                bytes_accessed=bytes_accessed),
        )(xr)
        return out.reshape(N, C, H, W)

    # Fallback: padded-scratch kernel, many planes per step, halo-only zeroing.
    xr = x.reshape(R, H, W)
    B = max(1, min(R, _WINDOW_BLOCK_BYTES // max(1, H * W * 4)))
    kernel = functools.partial(
        _lrn_spatial_pad_kernel, local_size=local_size,
        alpha_s=alpha / float(local_size * local_size), beta=beta)
    out = pl.pallas_call(
        kernel,
        out_shape=jax.ShapeDtypeStruct((R, H, W), x.dtype),
        grid=(pl.cdiv(R, B),),
        in_specs=[pl.BlockSpec((B, H, W), lambda i: (i, 0, 0))],
        out_specs=pl.BlockSpec((B, H, W), lambda i: (i, 0, 0)),
        scratch_shapes=[pltpu.VMEM((B, H + 2 * p, W + 2 * p), jnp.float32)],
        compiler_params=pltpu.CompilerParams(
            dimension_semantics=("parallel",),
            vmem_limit_bytes=_VMEM_LIMIT_BYTES),
        cost_estimate=pl.CostEstimate(
            flops=(2 * local_size + 6) * total, transcendentals=2 * total,
            bytes_accessed=bytes_accessed),
    )(xr)
    return out.reshape(N, C, H, W)


# ---------------------------------------------------------------- reference ----

def lrn_reference(x, local_size=1, alpha=1.0, beta=0.75, across_channels=False):
    """Pure-JAX reference matching PyTorch LRN.forward (AvgPool count_include_pad=True)."""
    x = x.astype(jnp.float32)
    N, C, H, W = x.shape
    p = (local_size - 1) // 2
    xsq = x * x
    if across_channels:
        pad = jnp.pad(xsq, ((0, 0), (p, p), (0, 0), (0, 0)))
        acc = jnp.zeros_like(xsq)
        for dc in range(local_size):
            acc = acc + pad[:, dc:dc + C, :, :]
        avg = acc / float(local_size)
    else:
        pad = jnp.pad(xsq, ((0, 0), (0, 0), (p, p), (p, p)))
        acc = jnp.zeros_like(xsq)
        for dy in range(local_size):
            for dx in range(local_size):
                acc = acc + pad[:, :, dy:dy + H, dx:dx + W]
        avg = acc / float(local_size * local_size)
    div = (avg * alpha + 1.0) ** beta
    return x / div


if __name__ == "__main__":
    key = jax.random.PRNGKey(0)
    x_main = jax.random.normal(key, (2, 4, 16, 16), dtype=jnp.float32)
    x_odd = jax.random.normal(jax.random.fold_in(key, 1), (2, 5, 13, 13), dtype=jnp.float32)

    cases = [
        (x_main, dict(local_size=1, alpha=1.0, beta=0.75, across_channels=False)),  # module defaults
        (x_main, dict(local_size=1, alpha=1.0, beta=0.75, across_channels=True)),
        (x_main, dict(local_size=3, alpha=1.0, beta=0.75, across_channels=False)),  # flat spatial path
        (x_main, dict(local_size=3, alpha=1e-4, beta=0.75, across_channels=True)),
        (x_main, dict(local_size=5, alpha=1.0, beta=0.75, across_channels=False)),
        (x_odd,  dict(local_size=3, alpha=1.0, beta=0.75, across_channels=False)),  # fallback spatial path
        (x_odd,  dict(local_size=5, alpha=1.0, beta=0.75, across_channels=True)),   # partial lane-tail blocks
    ]
    for xin, cfg in cases:
        out = lrn_pallas(xin, **cfg)
        jax.block_until_ready(out)
        ref = lrn_reference(xin, **cfg)
        assert jnp.allclose(out, ref, atol=1e-5, rtol=1e-5), f"mismatch for {cfg}, shape {xin.shape}"

    print("KERNEL_OK")
</pallas_src>

<mosaic_0001>
module attributes {stable_mosaic.version = 11 : i64} {
  func.func @_lrn_pointwise_kernel(%arg0: i32, %arg1: memref<8x256xf32, #tpu.memory_space<vmem>>, %arg2: memref<8x256xf32, #tpu.memory_space<vmem>>) attributes {dimension_semantics = [#tpu.dimension_semantics<parallel>], iteration_bounds = array<i64: 1>, scalar_prefetch = 0 : i64, scratch_operands = 0 : i64, tpu.core_type = #tpu.core_type<tc>, window_params = [{transform_indices = @transform_0, window_bounds = array<i64: 8, 256>}, {transform_indices = @transform_1, window_bounds = array<i64: 8, 256>}]} {
    %c0 = arith.constant 0 : index
    %c0_0 = arith.constant 0 : index
    %0 = vector.load %arg1[%c0, %c0_0] : memref<8x256xf32, #tpu.memory_space<vmem>>, vector<8x256xf32>
    %1 = arith.mulf %0, %0 : vector<8x256xf32>
    %cst = arith.constant 1.000000e+00 : f32
    %2 = vector.broadcast %cst : f32 to vector<8x256xf32>
    %3 = arith.mulf %1, %2 : vector<8x256xf32>
    %cst_1 = arith.constant 1.000000e+00 : f32
    %4 = vector.broadcast %cst_1 : f32 to vector<8x256xf32>
    %5 = arith.addf %3, %4 : vector<8x256xf32>
    %6 = math.log %5 : vector<8x256xf32>
    %cst_2 = arith.constant -7.500000e-01 : f32
    %7 = vector.broadcast %cst_2 : f32 to vector<8x256xf32>
    %8 = arith.mulf %7, %6 : vector<8x256xf32>
    %9 = math.exp %8 : vector<8x256xf32>
    %10 = arith.mulf %0, %9 : vector<8x256xf32>
    %c0_3 = arith.constant 0 : index
    %c0_4 = arith.constant 0 : index
    %11 = vector.load %arg2[%c0_3, %c0_4] : memref<8x256xf32, #tpu.memory_space<vmem>>, vector<8x256xf32>
    tpu.vector_store %arg2[%c0_3, %c0_4], %10 {strides = array<i32>} : memref<8x256xf32, #tpu.memory_space<vmem>>, vector<8x256xf32>,
    return
  }
  func.func @transform_0(%arg0: i32) -> (i32, i32) {
    %c0_i32 = arith.constant 0 : i32
    %c0_i32_0 = arith.constant 0 : i32
    return %arg0, %c0_i32 : i32, i32
  }
  func.func @transform_1(%arg0: i32) -> (i32, i32) {
    %c0_i32 = arith.constant 0 : i32
    %c0_i32_0 = arith.constant 0 : i32
    return %arg0, %c0_i32 : i32, i32
  }
}

</mosaic_0001>

<bundles_post_ra>
// kernel: tpu_custom_call.1
= control target key start
LH: loop header
LB: loop body
LE: loop exit
PB: predicated region body
PF: predicated region fallthrough
CT: control target
= control target key end

     0   :  { %6 = vsyncpa [#allocation3], 0  ;;  %s150_s0 = inlined_call_operand.hbm [shape: f32[8,256], index: 0, kind: input, shape index: {}]   ;;  %s151_s1 = inlined_call_operand.hbm [shape: f32[8,256], index: 1, kind: output, shape index: {}]  }
   0x1   :  { %7 = vsyncpa [#allocation4], 0  ;;  %s114_s6 = smov [#allocation2]   ;;  %s66_s10 = scalar_lea.hbm %s150_s0, 256 }
   0x2   :  { %s14_s7 = sshll.u32 %s114_s6, 4  ;;  %p67_p0 = scmp.ne.s32.totalorder %s150_s0, %s66_s10  ;;  %s15_s7 = int_to_ptr.vmem [resolvable:$true] %s14_s7 }
   0x3   :  { %p70_p1 = scmp.lt.u32.totalorder %s66_s10, %s150_s0 }
   0x5   :  { %p72_p2 = pnand %p70_p1, %p67_p0 }
   0x7   :  { %75 = shalt.err (!%p72_p2)
}
   0x8   :  { %s76_s15 = scalar_lea.vmem %s15_s7, 256  ;;  %p81_p4 = scmp.lt.s32.totalorder %s15_s7, %s15_s7 }
   0x9   :  { %p77_p3 = scmp.ne.s32.totalorder %s15_s7, %s76_s15  ;;  %p82_p5 = scmp.lt.s32.totalorder %s76_s15, %s76_s15 }
   0xb   :  { %p83_p6 = por %p82_p5, %p81_p4 }
   0xd   :  { %p84_p7 = pnand %p83_p6, %p77_p3 }
   0xf   :  { %87 = shalt.err (!%p84_p7)
}
  0x10   :  { %17 = dma.hbm_to_vmem [thread:$0]  %s150_s0, 256, %s15_s7, [#allocation3]  }
  0x11   :  { %110 = dma.done.wait [#allocation3], 256  }
  0x12   :  { %111 = vsyncadd [#allocation3], 4294967040  ;;  %v21_v0 = vld [vmem:[#allocation2] sm:$0xff]  ;;  %v22_v1 = vld [vmem:[#allocation2 + $0x8] sm:$0xff]  ;;  %s115_s0 = smov [#allocation5]  }
  0x13   :  { %v23_v2 = vmul.f32 %v21_v0, %v21_v0  ;;  %v24_v3 = vmul.f32 %v22_v1, %v22_v1  ;;  %s47_s18 = sshll.u32 %s115_s0, 4  ;;  %s48_s18 = int_to_ptr.vmem [resolvable:$true] %s47_s18 }
  0x14   :  { %s88_s19 = scalar_lea.vmem %s48_s18, 256  ;;  %p93_p9 = scmp.lt.s32.totalorder %s48_s18, %s48_s18 }
  0x15   :  { %v25_v4 = vadd.f32 1.0, %v23_v2  ;;  %v26_v5 = vadd.f32 1.0, %v24_v3  ;;  %p89_p8 = scmp.ne.s32.totalorder %s48_s18, %s88_s19  ;;  %p94_p10 = scmp.lt.s32.totalorder %s88_s19, %s88_s19 }
  0x17   :  { %58 = vlog2.f32 %v25_v4  ;;  %p95_p11 = por %p94_p10, %p93_p9 }
  0x18   :  { %60 = vlog2.f32 %v26_v5 }
  0x19   :  { %p96_p12 = pnand %p95_p11, %p89_p8 }
  0x21   :  { %v59_v6 = vpop.eup %58 }
  0x22   :  { %v61_v7 = vpop.eup %60  ;;  %v28_v8 = vmul.f32 0.6931472, %v59_v6 }
  0x23   :  { %v30_v9 = vmul.f32 0.6931472, %v61_v7 }
  0x24   :  { %v31_v10 = vmul.f32 -0.75, %v28_v8 }
  0x25   :  { %v32_v11 = vmul.f32 -0.75, %v30_v9 }
  0x26   :  { %v33_v12 = vmul.f32 1.442695, %v31_v10 }
  0x27   :  { %v35_v13 = vmul.f32 1.442695, %v32_v11 }
  0x28   :  { %62 = vpow2.f32 %v33_v12 }
  0x29   :  { %64 = vpow2.f32 %v35_v13 }
  0x32   :  { %v63_v14 = vpop.eup %62 }
  0x33   :  { %v65_v15 = vpop.eup %64  ;;  %v37_v16 = vmul.f32 %v63_v14, %v21_v0 }
  0x34   :  { %v38_v17 = vmul.f32 %v65_v15, %v22_v1 }
  0x35   :  { %39 = vst [vmem:[#allocation5] sm:$0xff] %v37_v16 }
  0x36   :  { %40 = vst [vmem:[#allocation5 + $0x8] sm:$0xff] %v38_v17 }
  0x37   :  { %99 = shalt.err (!%p96_p12)
}
  0x38   :  { %s100_s22 = scalar_lea.hbm %s151_s1, 256 }
  0x39   :  { %p101_p13 = scmp.ne.s32.totalorder %s151_s1, %s100_s22  ;;  %p104_p0 = scmp.lt.u32.totalorder %s100_s22, %s151_s1 }
  0x3b   :  { %p106_p1 = pnand %p104_p0, %p101_p13 }
  0x3d   :  { %109 = shalt.err (!%p106_p1)
}
  0x3e   :  { %50 = dma.vmem_to_hbm [thread:$0]  %s48_s18, 256, %s151_s1, [#allocation4]  }
  0x3f   :  { %112 = dma.done.wait [#allocation4], 256  }
  0x40   :  { %113 = vsyncadd [#allocation4], 4294967040 }
  0x41   :  { %54 = vsyncpa [#allocation3], 1 }
  0x42   :  { %55 = vsyncpa [#allocation4], 1 }

</bundles_post_ra>
